<compile_context>
chip_gen: v5e
topology: v5e:2x2
jax: 0.10.0
libtpu: 0.0.40
codegen_flags: <defaults>
</compile_context>

<pallas_src>
import functools

import jax
import jax.numpy as jnp
from jax import lax
from jax.experimental import pallas as pl
from jax.experimental.pallas import tpu as pltpu


def _mhsa_kernel(x_ref, wqkv_ref, bqkv_ref, o_ref, *,
                 nH, H, T, bt, scale, compute_dtype):
    allH = nH * H

    # ---- fused QKV projection: one (bt*T, allH) @ (allH, 3*allH) matmul ----
    x2d = x_ref[...].reshape(bt * T, allH).astype(compute_dtype)
    w = wqkv_ref[...].astype(compute_dtype)
    qkv = jnp.dot(x2d, w, preferred_element_type=jnp.float32) + bqkv_ref[...]
    # qkv: (bt*T, 3*allH) float32

    # ---- split into per-(batch, head) stacks: (bt*nH, T, H) ----------------
    def heads(col0):
        blocks = []
        for b in range(bt):
            rows = qkv[b * T:(b + 1) * T]
            for h in range(nH):
                lo = col0 + h * H
                blocks.append(rows[:, lo:lo + H])
        return jnp.stack(blocks, axis=0)

    q = heads(0)
    k = heads(allH)
    v = heads(2 * allH)

    # ---- scores + causal mask + softmax, batched over all heads ------------
    # NOTE: scale uses allH ** 0.5 (full hidden dim) to match PyTorch module.
    s = jnp.einsum("bqd,bkd->bqk",
                   q.astype(compute_dtype), k.astype(compute_dtype),
                   preferred_element_type=jnp.float32) * scale

    row = lax.broadcasted_iota(jnp.int32, (T, T), 0)
    col = lax.broadcasted_iota(jnp.int32, (T, T), 1)
    s = jnp.where((row >= col)[None], s, -jnp.inf)

    m = jnp.max(s, axis=-1, keepdims=True)
    p = jnp.exp(s - m)
    p = p * pl.reciprocal(jnp.sum(p, axis=-1, keepdims=True), approx=True)

    # ---- attention-weighted values, batched over (batch, head) -------------
    out = jnp.einsum("bqk,bkd->bqd",
                     p.astype(compute_dtype), v.astype(compute_dtype),
                     preferred_element_type=jnp.float32)   # (bt*nH, T, H)

    # ---- merge heads and store once, lane-dense (bt, T, allH) --------------
    rows_out = []
    for b in range(bt):
        rows_out.append(
            jnp.concatenate([out[b * nH + h] for h in range(nH)], axis=-1))
    o_ref[...] = jnp.stack(rows_out, axis=0).astype(o_ref.dtype)


def multihead_masked_self_attention(x, params, *, nheads,
                                    batch_tile=None,
                                    compute_dtype=jnp.float32):
    """x: [B, T, allH] float32.  params: dict of Wq,bq,Wk,bk,Wv,bv (PyTorch
    nn.Linear convention, W: [out, in])."""
    B, T, allH = x.shape
    assert allH % nheads == 0
    H = allH // nheads
    scale = 1.0 / (allH ** 0.5)

    # Host-side: pre-transpose to [in, out] and pack Q/K/V into one matmul.
    wqkv = jnp.concatenate(
        [params["Wq"].T, params["Wk"].T, params["Wv"].T], axis=1)        # (allH, 3*allH)
    bqkv = jnp.concatenate(
        [params["bq"], params["bk"], params["bv"]]).reshape(1, 3 * allH)

    if batch_tile is None:
        # Aim for >=128 projection rows per grid step, but keep >=2 grid
        # steps when possible so both v7x TensorCores get work.
        bt = max(1, min(max(1, 128 // max(T, 1)), B // 2 if B >= 2 else B))
        while B % bt:
            bt -= 1
    else:
        bt = batch_tile
    assert B % bt == 0

    kernel = functools.partial(_mhsa_kernel, nH=nheads, H=H, T=T, bt=bt,
                               scale=scale, compute_dtype=compute_dtype)

    return pl.pallas_call(
        kernel,
        out_shape=jax.ShapeDtypeStruct((B, T, allH), jnp.float32),
        grid_spec=pltpu.PrefetchScalarGridSpec(
            num_scalar_prefetch=0,
            grid=(B // bt,),
            in_specs=[
                pl.BlockSpec((bt, T, allH), lambda b: (b, 0, 0)),        # x
                pl.BlockSpec((allH, 3 * allH), lambda b: (0, 0)),        # Wqkv
                pl.BlockSpec((1, 3 * allH), lambda b: (0, 0)),           # bqkv
            ],
            out_specs=pl.BlockSpec((bt, T, allH), lambda b: (b, 0, 0)),
        ),
        compiler_params=pltpu.CompilerParams(
            dimension_semantics=("parallel",)),
    )(x, wqkv, bqkv)


def _reference(x, params, *, nheads):
    """Pure-JAX reference mirroring the PyTorch forward exactly."""
    B, T, allH = x.shape
    H = allH // nheads

    def lin(w, b):
        return x @ w.T + b

    def cast(a):  # [B,T,allH] -> [B*nH, T, H]
        return a.reshape(B, T, nheads, H).transpose(0, 2, 1, 3).reshape(
            B * nheads, T, H)

    q = cast(lin(params["Wq"], params["bq"]))
    k = cast(lin(params["Wk"], params["bk"]))
    v = cast(lin(params["Wv"], params["bv"]))

    att = jnp.einsum("btd,bsd->bts", q, k) / (allH ** 0.5)
    mask = jnp.tril(jnp.ones((T, T)))[None]
    att = jnp.where(mask == 0, -jnp.inf, att)
    att = jax.nn.softmax(att, axis=-1)
    out = jnp.einsum("bts,bsd->btd", att, v)
    return out.reshape(B, nheads, T, H).transpose(0, 2, 1, 3).reshape(B, T, allH)


if __name__ == "__main__":
    # Small shapes consistent with the module: B=2, T(seq)=8, h_dim=32, nheads=4.
    B, T, h_dim, nheads = 2, 8, 32, 4

    key = jax.random.PRNGKey(0)
    kx, kq, kbq, kk, kbk, kv, kbv = jax.random.split(key, 7)

    x = jax.random.normal(kx, (B, T, h_dim), dtype=jnp.float32)
    params = {
        "Wq": jax.random.normal(kq, (h_dim, h_dim), dtype=jnp.float32) * 0.1,
        "bq": jax.random.normal(kbq, (h_dim,), dtype=jnp.float32) * 0.1,
        "Wk": jax.random.normal(kk, (h_dim, h_dim), dtype=jnp.float32) * 0.1,
        "bk": jax.random.normal(kbk, (h_dim,), dtype=jnp.float32) * 0.1,
        "Wv": jax.random.normal(kv, (h_dim, h_dim), dtype=jnp.float32) * 0.1,
        "bv": jax.random.normal(kbv, (h_dim,), dtype=jnp.float32) * 0.1,
    }

    out = multihead_masked_self_attention(x, params, nheads=nheads)
    out = jax.block_until_ready(out)

    ref = _reference(x, params, nheads=nheads)
    assert out.shape == (B, T, h_dim)
    # Tolerance loosened slightly (vs 1e-5) because the softmax denominator
    # uses the hardware approximate reciprocal (EUP vrcp).
    assert jnp.allclose(out, ref, atol=2e-3, rtol=2e-3), "mismatch vs reference"

    print("KERNEL_OK")
</pallas_src>

<mosaic_0001>
module attributes {stable_mosaic.version = 11 : i64} {
  func.func @_mhsa_kernel(%arg0: i32, %arg1: memref<1x8x32xf32, #tpu.memory_space<vmem>>, %arg2: memref<32x96xf32, #tpu.memory_space<vmem>>, %arg3: memref<1x96xf32, #tpu.memory_space<vmem>>, %arg4: memref<1x8x32xf32, #tpu.memory_space<vmem>>) attributes {dimension_semantics = [#tpu.dimension_semantics<parallel>], iteration_bounds = array<i64: 2>, scalar_prefetch = 0 : i64, scratch_operands = 0 : i64, tpu.core_type = #tpu.core_type<tc>, window_params = [{transform_indices = @transform_0, window_bounds = array<i64: 1, 8, 32>}, {pipeline_mode = #tpu.pipeline_mode<synchronous>, transform_indices = @transform_1, window_bounds = array<i64: 32, 96>}, {pipeline_mode = #tpu.pipeline_mode<synchronous>, transform_indices = @transform_2, window_bounds = array<i64: 1, 96>}, {transform_indices = @transform_3, window_bounds = array<i64: 1, 8, 32>}]} {
    %c0 = arith.constant 0 : index
    %c0_0 = arith.constant 0 : index
    %c0_1 = arith.constant 0 : index
    %0 = vector.load %arg1[%c0, %c0_0, %c0_1] : memref<1x8x32xf32, #tpu.memory_space<vmem>>, vector<1x8x32xf32>
    %1 = vector.shape_cast %0 : vector<1x8x32xf32> to vector<8x32xf32>
    %c0_2 = arith.constant 0 : index
    %c0_3 = arith.constant 0 : index
    %2 = vector.load %arg2[%c0_2, %c0_3] : memref<32x96xf32, #tpu.memory_space<vmem>>, vector<32x96xf32>
    %cst = arith.constant dense<0.000000e+00> : vector<8x96xf32>
    %3 = tpu.matmul %1, %2, %cst {dimension_numbers = #tpu.dot_dimension_numbers<[1], [0], [0], [1], [0, 0, 1, 1], [], []>} : vector<8x32xf32>, vector<32x96xf32>, vector<8x96xf32> -> vector<8x96xf32>
    %c0_4 = arith.constant 0 : index
    %c0_5 = arith.constant 0 : index
    %4 = vector.load %arg3[%c0_4, %c0_5] : memref<1x96xf32, #tpu.memory_space<vmem>>, vector<1x96xf32>
    %5 = vector.broadcast %4 : vector<1x96xf32> to vector<8x96xf32>
    %6 = arith.addf %3, %5 : vector<8x96xf32>
    %7 = vector.extract_strided_slice %6 {offsets = [0, 0], sizes = [8, 8], strides = [1, 1]} : vector<8x96xf32> to vector<8x8xf32>
    %8 = vector.extract_strided_slice %6 {offsets = [0, 8], sizes = [8, 8], strides = [1, 1]} : vector<8x96xf32> to vector<8x8xf32>
    %9 = vector.extract_strided_slice %6 {offsets = [0, 16], sizes = [8, 8], strides = [1, 1]} : vector<8x96xf32> to vector<8x8xf32>
    %10 = vector.extract_strided_slice %6 {offsets = [0, 24], sizes = [8, 8], strides = [1, 1]} : vector<8x96xf32> to vector<8x8xf32>
    %11 = vector.shape_cast %7 : vector<8x8xf32> to vector<1x8x8xf32>
    %12 = vector.shape_cast %8 : vector<8x8xf32> to vector<1x8x8xf32>
    %13 = vector.shape_cast %9 : vector<8x8xf32> to vector<1x8x8xf32>
    %14 = vector.shape_cast %10 : vector<8x8xf32> to vector<1x8x8xf32>
    %15 = tpu.concatenate %11, %12, %13, %14 in 0 : vector<1x8x8xf32>, vector<1x8x8xf32>, vector<1x8x8xf32>, vector<1x8x8xf32> -> vector<4x8x8xf32>
    %16 = vector.extract_strided_slice %6 {offsets = [0, 32], sizes = [8, 8], strides = [1, 1]} : vector<8x96xf32> to vector<8x8xf32>
    %17 = vector.extract_strided_slice %6 {offsets = [0, 40], sizes = [8, 8], strides = [1, 1]} : vector<8x96xf32> to vector<8x8xf32>
    %18 = vector.extract_strided_slice %6 {offsets = [0, 48], sizes = [8, 8], strides = [1, 1]} : vector<8x96xf32> to vector<8x8xf32>
    %19 = vector.extract_strided_slice %6 {offsets = [0, 56], sizes = [8, 8], strides = [1, 1]} : vector<8x96xf32> to vector<8x8xf32>
    %20 = vector.shape_cast %16 : vector<8x8xf32> to vector<1x8x8xf32>
    %21 = vector.shape_cast %17 : vector<8x8xf32> to vector<1x8x8xf32>
    %22 = vector.shape_cast %18 : vector<8x8xf32> to vector<1x8x8xf32>
    %23 = vector.shape_cast %19 : vector<8x8xf32> to vector<1x8x8xf32>
    %24 = tpu.concatenate %20, %21, %22, %23 in 0 : vector<1x8x8xf32>, vector<1x8x8xf32>, vector<1x8x8xf32>, vector<1x8x8xf32> -> vector<4x8x8xf32>
    %25 = vector.extract_strided_slice %6 {offsets = [0, 64], sizes = [8, 8], strides = [1, 1]} : vector<8x96xf32> to vector<8x8xf32>
    %26 = vector.extract_strided_slice %6 {offsets = [0, 72], sizes = [8, 8], strides = [1, 1]} : vector<8x96xf32> to vector<8x8xf32>
    %27 = vector.extract_strided_slice %6 {offsets = [0, 80], sizes = [8, 8], strides = [1, 1]} : vector<8x96xf32> to vector<8x8xf32>
    %28 = vector.extract_strided_slice %6 {offsets = [0, 88], sizes = [8, 8], strides = [1, 1]} : vector<8x96xf32> to vector<8x8xf32>
    %29 = vector.shape_cast %25 : vector<8x8xf32> to vector<1x8x8xf32>
    %30 = vector.shape_cast %26 : vector<8x8xf32> to vector<1x8x8xf32>
    %31 = vector.shape_cast %27 : vector<8x8xf32> to vector<1x8x8xf32>
    %32 = vector.shape_cast %28 : vector<8x8xf32> to vector<1x8x8xf32>
    %33 = tpu.concatenate %29, %30, %31, %32 in 0 : vector<1x8x8xf32>, vector<1x8x8xf32>, vector<1x8x8xf32>, vector<1x8x8xf32> -> vector<4x8x8xf32>
    "tpu.trace_start"() <{level = 10 : i32, message = "bqd,bkd->bqk"}> : () -> ()
    %cst_6 = arith.constant dense<0.000000e+00> : vector<4x8x8xf32>
    %34 = tpu.matmul %15, %24, %cst_6 {dimension_numbers = #tpu.dot_dimension_numbers<[2], [2], [1], [1], [0, 0, 0, 1, 1, 1], [0], [0]>} : vector<4x8x8xf32>, vector<4x8x8xf32>, vector<4x8x8xf32> -> vector<4x8x8xf32>
    "tpu.trace_stop"() : () -> ()
    %cst_7 = arith.constant 0.176776692 : f32
    %35 = vector.broadcast %cst_7 : f32 to vector<4x8x8xf32>
    %36 = arith.mulf %34, %35 : vector<4x8x8xf32>
    %37 = tpu.iota {dimensions = array<i32: 0>} : vector<8x8xi32>
    %38 = tpu.iota {dimensions = array<i32: 1>} : vector<8x8xi32>
    %39 = arith.cmpi sge, %37, %38 : vector<8x8xi32>
    %40 = vector.shape_cast %39 : vector<8x8xi1> to vector<1x8x8xi1>
    %cst_8 = arith.constant 0xFF800000 : f32
    %41 = vector.shape_cast %40 : vector<1x8x8xi1> to vector<1x8x8xi1>
    %42 = vector.broadcast %41 : vector<1x8x8xi1> to vector<4x8x8xi1>
    %43 = vector.broadcast %cst_8 : f32 to vector<4x8x8xf32>
    %44 = arith.select %42, %36, %43 : vector<4x8x8xi1>, vector<4x8x8xf32>
    %cst_9 = arith.constant dense<0xFF800000> : vector<4x8xf32>
    %45 = vector.multi_reduction <maximumf>, %44, %cst_9 [2] : vector<4x8x8xf32> to vector<4x8xf32>
    %46 = vector.shape_cast %45 : vector<4x8xf32> to vector<4x8x1xf32>
    %47 = vector.broadcast %46 : vector<4x8x1xf32> to vector<4x8x8xf32>
    %48 = arith.subf %44, %47 : vector<4x8x8xf32>
    %49 = math.exp %48 : vector<4x8x8xf32>
    %cst_10 = arith.constant dense<0.000000e+00> : vector<4x8xf32>
    %50 = vector.multi_reduction <add>, %49, %cst_10 [2] : vector<4x8x8xf32> to vector<4x8xf32>
    %51 = vector.shape_cast %50 : vector<4x8xf32> to vector<4x8x1xf32>
    %52 = tpu.reciprocal %51 {approx = true} : vector<4x8x1xf32> -> vector<4x8x1xf32>
    %53 = vector.broadcast %52 : vector<4x8x1xf32> to vector<4x8x8xf32>
    %54 = arith.mulf %49, %53 : vector<4x8x8xf32>
    "tpu.trace_start"() <{level = 10 : i32, message = "bqk,bkd->bqd"}> : () -> ()
    %cst_11 = arith.constant dense<0.000000e+00> : vector<4x8x8xf32>
    %55 = tpu.matmul %54, %33, %cst_11 {dimension_numbers = #tpu.dot_dimension_numbers<[2], [1], [1], [2], [0, 0, 0, 1, 1, 2], [0], [0]>} : vector<4x8x8xf32>, vector<4x8x8xf32>, vector<4x8x8xf32> -> vector<4x8x8xf32>
    "tpu.trace_stop"() : () -> ()
    %56 = vector.extract_strided_slice %55 {offsets = [0, 0, 0], sizes = [1, 8, 8], strides = [1, 1, 1]} : vector<4x8x8xf32> to vector<1x8x8xf32>
    %57 = vector.shape_cast %56 : vector<1x8x8xf32> to vector<8x8xf32>
    %58 = vector.extract_strided_slice %55 {offsets = [1, 0, 0], sizes = [1, 8, 8], strides = [1, 1, 1]} : vector<4x8x8xf32> to vector<1x8x8xf32>
    %59 = vector.shape_cast %58 : vector<1x8x8xf32> to vector<8x8xf32>
    %60 = vector.extract_strided_slice %55 {offsets = [2, 0, 0], sizes = [1, 8, 8], strides = [1, 1, 1]} : vector<4x8x8xf32> to vector<1x8x8xf32>
    %61 = vector.shape_cast %60 : vector<1x8x8xf32> to vector<8x8xf32>
    %62 = vector.extract_strided_slice %55 {offsets = [3, 0, 0], sizes = [1, 8, 8], strides = [1, 1, 1]} : vector<4x8x8xf32> to vector<1x8x8xf32>
    %63 = vector.shape_cast %62 : vector<1x8x8xf32> to vector<8x8xf32>
    %64 = tpu.concatenate %57, %59, %61, %63 in 1 : vector<8x8xf32>, vector<8x8xf32>, vector<8x8xf32>, vector<8x8xf32> -> vector<8x32xf32>
    %65 = vector.shape_cast %64 : vector<8x32xf32> to vector<1x8x32xf32>
    %c0_12 = arith.constant 0 : index
    %c0_13 = arith.constant 0 : index
    %c0_14 = arith.constant 0 : index
    %66 = vector.load %arg4[%c0_12, %c0_13, %c0_14] : memref<1x8x32xf32, #tpu.memory_space<vmem>>, vector<1x8x32xf32>
    tpu.vector_store %arg4[%c0_12, %c0_13, %c0_14], %65 {strides = array<i32>} : memref<1x8x32xf32, #tpu.memory_space<vmem>>, vector<1x8x32xf32>,
    return
  }
  func.func @transform_0(%arg0: i32) -> (i32, i32, i32) {
    %c0_i32 = arith.constant 0 : i32
    %c0_i32_0 = arith.constant 0 : i32
    %c0_i32_1 = arith.constant 0 : i32
    return %arg0, %c0_i32, %c0_i32_0 : i32, i32, i32
  }
  func.func @transform_1(%arg0: i32) -> (i32, i32) {
    %c0_i32 = arith.constant 0 : i32
    %c0_i32_0 = arith.constant 0 : i32
    %c0_i32_1 = arith.constant 0 : i32
    return %c0_i32, %c0_i32_0 : i32, i32
  }
  func.func @transform_2(%arg0: i32) -> (i32, i32) {
    %c0_i32 = arith.constant 0 : i32
    %c0_i32_0 = arith.constant 0 : i32
    %c0_i32_1 = arith.constant 0 : i32
    return %c0_i32, %c0_i32_0 : i32, i32
  }
  func.func @transform_3(%arg0: i32) -> (i32, i32, i32) {
    %c0_i32 = arith.constant 0 : i32
    %c0_i32_0 = arith.constant 0 : i32
    %c0_i32_1 = arith.constant 0 : i32
    return %arg0, %c0_i32, %c0_i32_0 : i32, i32, i32
  }
}

</mosaic_0001>

<bundles_post_ra>
// kernel: tpu_custom_call.1
= control target key start
LH: loop header
LB: loop body
LE: loop exit
PB: predicated region body
PF: predicated region fallthrough
CT: control target
= control target key end

     0   :  { %8 = vsyncpa [#allocation3], 0  ;;  %s1095_s0 = inlined_call_operand.hbm [shape: f32[2,8,32], index: 0, kind: input, shape index: {}]   ;;  %s1096_s1 = inlined_call_operand.hbm [shape: f32[32,96], index: 1, kind: input, shape index: {}]   ;;  %s1097_s2 = inlined_call_operand.vmem [shape: f32[1,96], index: 2, kind: input, shape index: {}]   ;;  %s1098_s3 = inlined_call_operand.hbm [shape: f32[2,8,32], index: 3, kind: output, shape index: {}]  }
   0x1   :  { %10 = vsyncpa [#allocation3 + $0x1], 0 }
   0x2   :  { %11 = vsyncpa [#allocation6], 0 }
   0x3   :  { %12 = vsyncpa [#allocation4], 0 }
   0x4   :  { %14 = vsyncpa [#allocation4 + $0x1], 0  ;;  %s906_s12 = smov 0   ;;  %s908_s13 = smov 0  }
   0x5   :  { %s910_s14 = smov 0   ;;  %s912_s15 = smov 0  }
   0x6 LB: > { %s130_s18 = sshll.u32 %s1096_s1, 4  ;;  %s930_s19 = sadd.s32 4294967295, %s873_s15   ;;  %s873_s15 = sphi %s912_s15, %s1108_s15   ;;  %s869_s14 = sphi %s910_s14, %s1107_s14   ;;  %s865_s13 = sphi %s908_s13, %s1106_s13   ;;  %s861_s12 = sphi %s906_s12, %s1105_s12   ;;  %s131_s18 = int_to_ptr.hbm [resolvable:$true] %s130_s18 }
   0x7   : > { %p628_p0 = scmp.ge.s32.totalorder %s873_s15, 1  ;;  %p41_p1 = scmp.eq.s32.totalorder %s930_s19, 0 }
   0x8   : > { %p119_p2 = scmp.lt.s32.totalorder %s873_s15, 3  ;;  %s875_s21 = smov [#allocation5]  }
   0x9   : > { %s132_s22 = sshll.u32 %s875_s21, 4  ;;  %s876_s23 = smov 128   ;;  %s133_s22 = int_to_ptr.vmem [resolvable:$true] %s132_s22 }
   0xa   : > { %p935_p3 = pnand %p628_p0, %p119_p2  ;;  %s877_s24 = smov 8  }
   0xb   : > { %s627_s25 = sadd.s32 4294967294, %s873_s15   ;;  %s946_s26 = sadd.s32 1, %s873_s15  }
   0xc   : > { %p662_p4 = pneg %p935_p3  ;;  %s27_s27 = sadd.s32 1, %s869_s14 }
   0xd   : > { %s24_s28 = ssub.s32 %s873_s15, %s946_s26  ;;  %p34_p7 = scmp.ne.s32.totalorder %s869_s14, %s865_s13 }
   0xe   : > { %p663_p6 = pnand %p662_p4, %p41_p1  ;;  %p25_p8 = scmp.eq.s32.totalorder %s24_s28, 0 }
   0xf   : > { %p35_p9 = scmp.eq.s32.totalorder %s873_s15, 0  ;;  %p40_p10 = scmp.ne.s32.totalorder %s865_s13, %s861_s12 }
  0x10   : > { %665 = dma.hbm_to_vmem [thread:$0]  (!%p663_p6), %s131_s18, 512, %s133_s22, [#allocation6], %s876_s23, %s876_s23, %s877_s24  }
  0x11   : > { %p106_p11 = scmp.eq.s32.totalorder %s930_s19, 1  ;;  %p962_p12 = por %p41_p1, %p40_p10 }
  0x12   : > { %s958_s29 = scalar_select %p25_p8, %s869_s14, %s27_s27  }
  0x13   : > { %p966_p13 = por %p106_p11, %p34_p7  ;;  %p112_p0 = scmp.eq.s32.totalorder %s627_s25, 1 }
  0x14   : > { %p36_p2 = por %p35_p9, %p34_p7  ;;  %s149_s5 = sand.u32 1, %s869_s14  }
  0x15   : > { %p971_p4 = por %p112_p0, %p40_p10  ;;  %p675_p6 = scmp.lt.s32.totalorder %s873_s15, 2 }
  0x16   : > { %s631_s7 = sshll.u32 %s149_s5, 3  ;;  %s632_s8 = sshll.u32 %s873_s15, 3 }
  0x17   : > { %s157_s11 = scalar_lea.hbm %s1095_s0, %s632_s8  ;;  %s153_s17 = scalar_lea.vmem [#allocation2], %s631_s7 }
  0x18   : > { %s159_s16 = sshll.u32 %s157_s11, 4  ;;  %s161_s18 = sshll.u32 %s153_s17, 4  ;;  %s160_s16 = int_to_ptr.hbm [resolvable:$true] %s159_s16  ;;  %s162_s18 = int_to_ptr.vmem [resolvable:$true] %s161_s18 }
  0x19   : > { %p980_p8 = pnand %p675_p6, %p36_p2  ;;  %s150_s22 = scalar_lea.sflag [#allocation3], %s149_s5 }
  0x1a   : > { %s773_s23 = sshra.s32 %s160_s16, 4  ;;  %s780_s28 = scalar_lea.hbm %s1095_s0, 16  ;;  %s774_s23 = int_to_ptr.hbm [resolvable:$true] %s773_s23 }
  0x1b   : > { %s775_s24 = scalar_lea.hbm %s774_s23, 8  ;;  %p777_p9 = pneg %p980_p8 }
  0x1c   : > { %p776_p7 = scmp.ne.s32.totalorder %s774_s23, %s775_s24  ;;  %p781_p0 = scmp.lt.s32.totalorder %s774_s23, %s1095_s0 }
  0x1d   : > { %p782_p2 = scmp.lt.s32.totalorder %s780_s28, %s775_s24 }
  0x1e   : > { %p778_p10 = pnand %p777_p9, %p776_p7 }
  0x1f   : > { %p783_p6 = por %p782_p2, %p781_p0 }
  0x20   : > { %p779_p11 = pneg %p778_p10 }
  0x22   : > { %p784_p5 = pnand %p783_p6, %p779_p11 }
  0x24   : > { %787 = shalt.err (!%p784_p5)
}
  0x25   : > { %669 = dma.hbm_to_vmem [thread:$0]  (!%p980_p8), %s160_s16, 128, %s162_s18, %s150_s22  }
  0x26   : > { %170 = sbr.rel (%p935_p3) target bundleno = 1080 (0x438), region = 32  ;;  %s997_s5 = sand.u32 (!%p935_p3), 1, %s865_s13  }
  0x27   : > { %s634_s9 = sshll.u32 (!%p935_p3), %s997_s5, 3  ;;  %s173_s10 = scalar_lea.sflag (!%p935_p3), [#allocation3], %s997_s5 }
  0x28   : > { %s176_s11 = scalar_lea.vmem (!%p935_p3), [#allocation2], %s634_s9 }
  0x2b   : > { %848 = dma.done.wait (%p962_p12), %s173_s10, 128  }
  0x2c   : > { %850 = vsyncadd (%p962_p12), %s173_s10, 4294967168 }
  0x2d   : > { %852 = dma.done.wait (%p41_p1), [#allocation6], 512  }
  0x2e   : > { %854 = vsyncadd (%p41_p1), [#allocation6], 4294966784  ;;  %v209_v0 = vld [vmem:[#allocation5 + $0x18] sm:$0xff]  ;;  %v208_v1 = vld [vmem:[#allocation5 + $0x10] sm:$0xff]  ;;  %vm214_vm0 = vcmask 261120   ;;  %s878_s16 = smov 96   ;;  %v354_v15 = vlaneseq }
  0x2f   : > { %230 = vmatpush.msra.mxu0 %v209_v0  ;;  %v207_v2 = vld [vmem:[#allocation5 + $0x8] sm:$0xff]  ;;  %v206_v3 = vld [vmem:[#allocation5] sm:$0xff]  ;;  %v205_v4 = vld [vmem:[%s176_s11] sm:$0xff]  ;;  %s879_s17 = smov 104   ;;  %s880_s18 = smov 120   ;;  %vm247_vm1 = vcmask 64512  }
  0x30   : > { %v726_v5 = vld [vmem:[%s1097_s2] ss:$0 sm:$0xff]  ;;  %s881_s21 = smov 112   ;;  %v355_v16 = vshrl.u32 %v354_v15, 7  ;;  %v357_v17 = vand.u32 127, %v354_v15  ;;  %s882_s22 = smov 64  }
  0x31   : > { %231 = vmatpush.msra.mxu0 %v208_v1  ;;  %s883_s23 = smov 16   ;;  %s884_s24 = smov 8   ;;  %vm526_vm3 = vcmask 130048   ;;  %vm528_vm4 = vcmask 195584  }
  0x32   : > { %vm358_vm2 = vcmp.ge.s32.totalorder %v355_v16, %v357_v17  ;;  %s885_s25 = smov 24   ;;  %s651_s27 = sshll.u32 %s930_s19, 3 }
  0x33   : > { %232 = vmatpush.msra.mxu0 %v207_v2  ;;  %s542_s8 = scalar_lea.hbm %s1098_s3, %s651_s27  ;;  %s204_s10 = scalar_lea.vmem [#allocation7], %s634_s9 }
  0x34   : > { %s544_s11 = sshll.u32 %s204_s10, 4  ;;  %s546_s20 = sshll.u32 %s542_s8, 4  ;;  %s545_s11 = int_to_ptr.vmem [resolvable:$true] %s544_s11  ;;  %s547_s20 = int_to_ptr.hbm [resolvable:$true] %s546_s20 }
  0x35   : > { %233 = vmatpush.msra.mxu0 %v206_v3  ;;  %s532_s19 = scalar_lea.sflag [#allocation4], %s997_s5  ;;  %s817_s30 = sshra.s32 %s547_s20, 4  ;;  %s818_s30 = int_to_ptr.hbm [resolvable:$true] %s817_s30 }
  0x36   : > { %637 = vmatmul.msk.f32.vlgmr.msra.gmra.mxu0 %vm214_vm0, %v205_v4  ;;  %p824_p12 = scmp.lt.s32.totalorder %s818_s30, %s1098_s3 }
  0xb3   : > { %v235_v6 = vpop.f32.mrf.mxu0 }
  0xb4   : > { %v1015_v7 = vadd.f32 %v726_v5, %v235_v6 }
  0xb6   : > { %245 = vrot.lane.b32.xlu2 %v1015_v7, %s878_s16  ;;  %243 = vrot.lane.b32.xlu1 %v1015_v7, %s879_s17 }
  0xb7   : > { %239 = vrot.lane.b32.xlu0 %v1015_v7, %s880_s18  ;;  %s823_s18 = scalar_lea.hbm %s1098_s3, 16 }
  0xbf   : > { %241 = vrot.lane.b32.xlu0 %v1015_v7, %s881_s21 }
 0x110   : > { %v246_v8 = vpop.permute.xlu2 %245 }
 0x111   : > { %638 = vmatpush.xpose.msk.msra.mxu1 %vm247_vm1, %v246_v8 }
 0x114   : > { %639 = vmatmul.msk.f32.vlgmr.msra.gmra.mxu1 %vm247_vm1, %v1015_v7 }
 0x128   : > { %v1024_v9 = vpop.permute.xlu1 %243 }
 0x129   : > { %v1026_v10 = vpop.permute.xlu0 %239  ;;  %324 = vrot.lane.b32.xlu0 %v1024_v9, %s878_s16 }
 0x12a   : > { %272 = vrot.lane.b32.xlu1 %v1026_v10, %s878_s16 }
 0x131   : > { %v1030_v11 = vpop.permute.xlu0 %241 }
 0x132   : > { %298 = vrot.lane.b32.xlu2 %v1030_v11, %s878_s16  ;;  %v721_v54 = vpack.i.bf16 %v1024_v9, %v1030_v11  ;;  %s819_s16 = scalar_lea.hbm %s818_s30, 8 }
 0x133   : > { %p820_p1 = scmp.ne.s32.totalorder %s818_s30, %s819_s16  ;;  %p825_p8 = scmp.lt.s32.totalorder %s823_s18, %s819_s16 }
 0x135   : > { %p821_p3 = pnand %p820_p1, %p966_p13  ;;  %p826_p7 = por %p825_p8, %p824_p12 }
 0x137   : > { %p822_p5 = pneg %p821_p3 }
 0x139   : > { %p827_p9 = pnand %p826_p7, %p822_p5 }
 0x18c   : > { %v299_v12 = vpop.permute.xlu2 %298 }
 0x18d   : > { %642 = vmatpush.xpose.msk.msra.mxu3 %vm247_vm1, %v299_v12 }
 0x190   : > { %643 = vmatmul.msk.f32.vlgmr.msra.gmra.mxu3 %vm247_vm1, %v1030_v11 }
 0x191   : > { %v269_v19 = vpop.f32.mrf.mxu1 }
 0x192   : > { %v350_v23 = vmul.f32 0.17677669, %v269_v19 }
 0x194   : > { %v361_v25 = vsel %vm358_vm2, %v350_v23, -inf }
 0x195   : > { %v365_v27 = vsel %vm247_vm1, %v361_v25, -inf }
 0x19b   : > { %v325_v13 = vpop.permute.xlu0 %324 }
 0x19c   : > { %v273_v14 = vpop.permute.xlu1 %272  ;;  %644 = vmatpush.xpose.msk.msrb.mxu1 %vm247_vm1, %v325_v13 }
 0x19d   : > { %640 = vmatpush.xpose.msk.msra.mxu2 %vm247_vm1, %v273_v14 }
 0x19f   : > { %645 = vmatmul.msk.f32.vlgmr.msrb.gmra.mxu1 %vm247_vm1, %v1024_v9 }
 0x1a0   : > { %641 = vmatmul.msk.f32.vlgmr.msra.gmra.mxu2 %vm247_vm1, %v1026_v10 }
 0x213   : > { %v321_v18 = vpop.f32.mrf.mxu3 }
 0x214   : > { %v352_v20 = vmul.f32 0.17677669, %v321_v18 }
 0x216   : > { %v363_v21 = vsel %vm358_vm2, %v352_v20, -inf }
 0x217   : > { %v371_v22 = vsel %vm247_vm1, %v363_v21, -inf }
 0x218   : > { %372 = vmax.xlane.f32.xlu2 %v371_v22 }
 0x21c   : > { %v347_v24 = vpop.f32.mrf.mxu1 }
 0x21d   : > { %v353_v26 = vmul.f32 0.17677669, %v347_v24 }
 0x21f   : > { %v364_v28 = vsel %vm358_vm2, %v353_v26, -inf }
 0x220   : > { %366 = vmax.xlane.f32.xlu2 %v365_v27  ;;  %v374_v29 = vsel %vm247_vm1, %v364_v28, -inf }
 0x221   : > { %375 = vmax.xlane.f32.xlu0 %v374_v29 }
 0x223   : > { %v295_v30 = vpop.f32.mrf.mxu2 }
 0x224   : > { %v351_v31 = vmul.f32 0.17677669, %v295_v30 }
 0x226   : > { %v362_v32 = vsel %vm358_vm2, %v351_v31, -inf }
 0x227   : > { %v368_v33 = vsel %vm247_vm1, %v362_v32, -inf }
 0x228   : > { %369 = vmax.xlane.f32.xlu1 %v368_v33 }
 0x28b   : > { %v373_v34 = vpop.xlane.xlu2 %372 }
 0x28c   : > { %v379_v35 = vsub.f32 %v363_v21, %v373_v34 }
 0x28e   : > { %v385_v36 = vmul.f32 1.442695, %v379_v35 }
 0x290   : > { %727 = vpow2.f32 %v385_v36 }
 0x293   : > { %v367_v37 = vpop.xlane.xlu2 %366 }
 0x294   : > { %v376_v38 = vpop.xlane.xlu0 %375  ;;  %v377_v41 = vsub.f32 %v361_v25, %v367_v37 }
 0x295   : > { %v380_v39 = vsub.f32 %v364_v28, %v376_v38 }
 0x296   : > { %v728_v40 = vpop.eup %727  ;;  %v381_v44 = vmul.f32 1.442695, %v377_v41 }
 0x297   : > { %v387_v42 = vmul.f32 1.442695, %v380_v39  ;;  %v395_v43 = vsel %vm247_vm1, %v728_v40, 0.0 }
 0x298   : > { %396 = vadd.xlane.f32.xlu2 %v395_v43 }
 0x299   : > { %729 = vpow2.f32 %v387_v42 }
 0x29a   : > { %731 = vpow2.f32 %v381_v44 }
 0x29b   : > { %v370_v45 = vpop.xlane.xlu1 %369 }
 0x29c   : > { %v378_v46 = vsub.f32 %v362_v32, %v370_v45 }
 0x29e   : > { %v383_v47 = vmul.f32 1.442695, %v378_v46 }
 0x29f   : > { %v730_v48 = vpop.eup %729 }
 0x2a0   : > { %733 = vpow2.f32 %v383_v47  ;;  %v398_v49 = vsel %vm247_vm1, %v730_v48, 0.0  ;;  %v732_v50 = vpop.eup %731 }
 0x2a1   : > { %399 = vadd.xlane.f32.xlu0 %v398_v49  ;;  %v389_v53 = vsel %vm247_vm1, %v732_v50, 0.0 }
 0x2a6   : > { %v734_v51 = vpop.eup %733 }
 0x2a7   : > { %v392_v52 = vsel %vm247_vm1, %v734_v51, 0.0 }
 0x2a8   : > { %393 = vadd.xlane.f32.xlu1 %v392_v52 }
 0x2a9   : > { %390 = vadd.xlane.f32.xlu0 %v389_v53 }
 0x2b0   : > { %722 = vrot.lane.b32.xlu2 %v721_v54, %s882_s22 }
 0x2bd   : > { %409 = vrot.lane.b32.xlu0 %v1015_v7, %s882_s22 }
 0x2c1   : > { %435 = vrot.lane.b32.xlu1 %v1026_v10, %s882_s22 }
 0x30b   : > { %v397_v55 = vpop.xlane.xlu2 %396 }
 0x30c   : > { %735 = vrcp.f32 %v397_v55 }
 0x312   : > { %v736_v56 = vpop.eup %735 }
 0x313   : > { %v723_v57 = vpop.permute.xlu2 %722  ;;  %v407_v61 = vmul.f32 %v736_v56, %v728_v40 }
 0x314   : > { %v725_v58 = vunpack.i.h.bf16 %v723_v57  ;;  %v400_v59 = vpop.xlane.xlu0 %399  ;;  %v724_v60 = vunpack.i.l.bf16 %v723_v57 }
 0x315   : > { %737 = vrcp.f32 %v400_v59 }
 0x316   : > { %482 = vmatpush.msrb.mxu0 %v724_v60  ;;  %508 = vmatpush.msra.mxu1 %v725_v58 }
 0x317   : > { %648 = vmatmul.msk.f32.vlgmr.msrb.gmra.mxu0 %vm247_vm1, %v407_v61 }
 0x31b   : > { %v738_v62 = vpop.eup %737  ;;  %v394_v1 = vpop.xlane.xlu1 %393 }
 0x31c   : > { %v408_v63 = vmul.f32 %v738_v62, %v730_v48  ;;  %v391_v0 = vpop.xlane.xlu0 %390 }
 0x31d   : > { %739 = vrcp.f32 %v391_v0 }
 0x31e   : > { %649 = vmatmul.msk.f32.vlgmr.msra.gmra.mxu1 %vm247_vm1, %v408_v63  ;;  %741 = vrcp.f32 %v394_v1 }
 0x323   : > { %v740_v2 = vpop.eup %739 }
 0x324   : > { %v405_v4 = vmul.f32 %v740_v2, %v732_v50  ;;  %v742_v5 = vpop.eup %741 }
 0x325   : > { %v406_v7 = vmul.f32 %v742_v5, %v734_v51 }
 0x32f   : > { %v410_v3 = vpop.permute.xlu0 %409 }
 0x330   : > { %430 = vmatpush.msrb.mxu2 %v410_v3 }
 0x331   : > { %646 = vmatmul.msk.f32.vlgmr.msrb.gmra.mxu2 %vm247_vm1, %v405_v4 }
 0x333   : > { %v436_v6 = vpop.permute.xlu1 %435 }
 0x334   : > { %456 = vmatpush.msrb.mxu3 %v436_v6 }
 0x335   : > { %647 = vmatmul.msk.f32.vlgmr.msrb.gmra.mxu3 %vm247_vm1, %v406_v7 }
 0x394   : > { %v484_v8 = vpop.f32.mrf.mxu0 }
 0x395   : > { %518 = vrot.lane.b32.xlu2 %v484_v8, %s883_s23 }
 0x39b   : > { %v510_v10 = vpop.f32.mrf.mxu1 }
 0x3b4   : > { %v432_v12 = vpop.f32.mrf.mxu2 }
 0x3b8   : > { %v458_v9 = vpop.f32.mrf.mxu3 }
 0x3b9   : > { %514 = vrot.lane.b32.xlu1 %v458_v9, %s884_s24 }
 0x3c1   : > { %522 = vrot.lane.b32.xlu1 %v510_v10, %s885_s25 }
 0x3ef   : > { %v519_v14 = vpop.permute.xlu2 %518 }
 0x42b   : > { %v515_v11 = vpop.permute.xlu1 %514 }
 0x42c   : > { %v525_v13 = vsel %vm247_vm1, %v432_v12, %v515_v11 }
 0x42d   : > { %v527_v16 = vsel %vm526_vm3, %v525_v13, %v519_v14 }
 0x433   : > { %v523_v15 = vpop.permute.xlu1 %522 }
 0x434   : > { %v529_v17 = vsel %vm528_vm4, %v527_v16, %v523_v15 }
 0x435   : > { %530 = vst.msk [vmem:[%s204_s10] sm:$0xff] %vm214_vm0, %v529_v17 }
 0x436   : > { %830 = shalt.err (!%p827_p9)
}
 0x437   : > { %660 = dma.vmem_to_hbm [thread:$0]  (%p966_p13), %s545_s11, 128, %s547_s20, %s532_s19  }
 0x438 PF: > { %s558_s5 = sand.u32 1, %s861_s12   ;;  %p1104_p10 = scmp.ge.s32.totalorder %s873_s15, 2 }
 0x439   : > { %s559_s23 = scalar_lea.sflag [#allocation4], %s558_s5 }
 0x43a   : > { %p671_p11 = pnand %p1104_p10, %p971_p4 }
 0x43c   : > { %p672_p0 = pneg %p671_p11 }
 0x43e   : > { %856 = dma.done.wait (%p672_p0), %s559_s23, 128  }
 0x43f   : > { %858 = vsyncadd (%p672_p0), %s559_s23, 4294967168  ;;  %p17_p2 = scmp.ge.s32.totalorder %s946_s26, 4   ;;  %s1105_s12 = smov %s865_s13 }
 0x440   : > { %s1106_s13 = smov %s869_s14  ;;  %s1107_s14 = smov %s958_s29 }
 0x441   : > { %s1108_s15 = smov %s946_s26  ;;  %19 = sbr.rel (!%p17_p2) target bundleno = 6 (0x6), region = 81 }
 0x446   :  { %565 = vsyncpa [#allocation3], 1 }
 0x447   :  { %567 = vsyncpa [#allocation3 + $0x1], 1 }
 0x448   :  { %568 = vsyncpa [#allocation6], 1 }
 0x449   :  { %569 = vsyncpa [#allocation4], 1 }
 0x44a   :  { %571 = vsyncpa [#allocation4 + $0x1], 1 }

</bundles_post_ra>
